<compile_context>
chip_gen: v5e
topology: v5e:2x2
jax: 0.10.0
libtpu: 0.0.40
codegen_flags: <defaults>
</compile_context>

<pallas_src>
import jax
import jax.numpy as jnp
from jax import lax
from jax.experimental import pallas as pl
from jax.experimental.pallas import tpu as pltpu

# Small, lane-aligned stand-ins for CFG.feature_dim / CFG.hidden_dim
FEATURE_DIM = 256
HIDDEN_DIM = 128
NUM_GCN_LAYERS = 4
LN_EPS = 1e-5


# ----------------------------------------------------------------------------
# Hardware-aware sizing helpers
# ----------------------------------------------------------------------------
def _round_up(a, b):
    return (a + b - 1) // b * b


def _physical_vmem_bytes():
    try:
        return int(pltpu.get_tpu_info().vmem_capacity_bytes)
    except Exception:
        return 64 * 1024 * 1024  # conservative (v7x per-TC VMEM)


def _vmem_limit(*buf_bytes):
    """Scoped-VMEM limit: double-buffered working set + headroom, capped below physical."""
    physical = _physical_vmem_bytes()
    need = 2 * int(sum(buf_bytes)) + (4 << 20)
    return int(min(max(need, 32 << 20), physical * 3 // 4))


def _choose_tiles(n):
    """Generation-aware (tm, tk) for the adjacency tiles and padded node count."""
    vmem = _physical_vmem_bytes()
    if vmem >= 96 * 1024 * 1024:      # v5e / v6e (128 MiB physical)
        target = 1024
    elif vmem >= 48 * 1024 * 1024:    # v7x (64 MiB per TC)
        target = 512
    else:
        target = 256
    n_pad = _round_up(max(n, 8), 128)
    tile = min(target, n_pad)
    n_pad = _round_up(n_pad, tile)
    return tile, tile, n_pad


# ----------------------------------------------------------------------------
# Kernels
# ----------------------------------------------------------------------------
def _hw_kernel(h_ref, w_ref, hw_ref):
    """hw = h @ W for one row tile; bf16 MXU inputs, f32 accumulation, bf16 out."""
    hw = jnp.dot(h_ref[...].astype(jnp.bfloat16), w_ref[...],
                 preferred_element_type=jnp.float32)
    hw_ref[...] = hw.astype(hw_ref.dtype)


def _gcn_agg_kernel(a_ref, hw_ref, b_ref, g_ref, be_ref, o_ref, acc_ref):
    """Accumulate A_tile @ hw_tile; at the last K step fuse bias + LN + ReLU."""
    k = pl.program_id(1)

    @pl.when(k == 0)
    def _():
        acc_ref[...] = jnp.zeros_like(acc_ref)

    acc_ref[...] += jnp.dot(a_ref[...], hw_ref[...],
                            preferred_element_type=jnp.float32)

    @pl.when(k == pl.num_programs(1) - 1)
    def _():
        y = acc_ref[...] + b_ref[...]
        mu = jnp.mean(y, axis=-1, keepdims=True)
        var = jnp.mean(y * y, axis=-1, keepdims=True) - mu * mu   # single-pass variance
        var = jnp.maximum(var, 0.0)
        yn = (y - mu) * lax.rsqrt(var + LN_EPS)                   # EUP rsqrt, no divide
        o_ref[...] = jnp.maximum(yn * g_ref[...] + be_ref[...], 0.0)


def _mean_pool_kernel(h_ref, m_ref, o_ref):
    """Masked sublane-sum over node row tiles; scale (sign*(1-sasp)/N) folded into mask."""
    i = pl.program_id(0)

    @pl.when(i == 0)
    def _():
        o_ref[...] = jnp.zeros_like(o_ref)

    o_ref[...] += jnp.sum(h_ref[...] * m_ref[...], axis=0, keepdims=True)


def _graph_pool_kernel(p_ref, h_ref, o_ref):
    """Multi-graph scatter_mean as a (G, N) @ (N, H) matmul, scale folded into pool."""
    k = pl.program_id(0)

    @pl.when(k == 0)
    def _():
        o_ref[...] = jnp.zeros_like(o_ref)

    o_ref[...] += jnp.dot(p_ref[...], h_ref[...],
                          preferred_element_type=jnp.float32)


# ----------------------------------------------------------------------------
# pallas_call wrappers
# ----------------------------------------------------------------------------
def _hw_matmul(h, w_bf16, tm):
    n_pad, fin = h.shape
    h_dim = w_bf16.shape[1]
    return pl.pallas_call(
        _hw_kernel,
        out_shape=jax.ShapeDtypeStruct((n_pad, h_dim), jnp.bfloat16),
        grid_spec=pltpu.PrefetchScalarGridSpec(
            num_scalar_prefetch=0,
            grid=(n_pad // tm,),
            in_specs=[pl.BlockSpec((tm, fin), lambda i: (i, 0)),
                      pl.BlockSpec((fin, h_dim), lambda i: (0, 0))],
            out_specs=pl.BlockSpec((tm, h_dim), lambda i: (i, 0))),
        compiler_params=pltpu.CompilerParams(
            dimension_semantics=("parallel",),
            vmem_limit_bytes=_vmem_limit(tm * fin * 4, fin * h_dim * 2,
                                         tm * h_dim * 2)),
    )(h, w_bf16)


def _gcn_aggregate(a_pad, hw, bias, gamma, beta, tm, tk):
    n_pad = a_pad.shape[0]
    h_dim = hw.shape[1]
    return pl.pallas_call(
        _gcn_agg_kernel,
        out_shape=jax.ShapeDtypeStruct((n_pad, h_dim), jnp.float32),
        grid_spec=pltpu.PrefetchScalarGridSpec(
            num_scalar_prefetch=0,
            grid=(n_pad // tm, n_pad // tk),
            in_specs=[pl.BlockSpec((tm, tk), lambda i, k: (i, k)),        # A tile (bf16)
                      pl.BlockSpec((tk, h_dim), lambda i, k: (k, 0)),     # hw tile (bf16)
                      pl.BlockSpec((1, h_dim), lambda i, k: (0, 0)),      # bias
                      pl.BlockSpec((1, h_dim), lambda i, k: (0, 0)),      # gamma
                      pl.BlockSpec((1, h_dim), lambda i, k: (0, 0))],     # beta
            out_specs=pl.BlockSpec((tm, h_dim), lambda i, k: (i, 0)),
            scratch_shapes=[pltpu.VMEM((tm, h_dim), jnp.float32)]),
        compiler_params=pltpu.CompilerParams(
            dimension_semantics=("parallel", "arbitrary"),
            vmem_limit_bytes=_vmem_limit(tm * tk * 2, tk * h_dim * 2,
                                         tm * h_dim * 4, tm * h_dim * 4)),
    )(a_pad, hw, bias, gamma, beta)


def _mean_pool(h, mask, tm):
    n_pad, h_dim = h.shape
    return pl.pallas_call(
        _mean_pool_kernel,
        out_shape=jax.ShapeDtypeStruct((1, h_dim), jnp.float32),
        grid_spec=pltpu.PrefetchScalarGridSpec(
            num_scalar_prefetch=0,
            grid=(n_pad // tm,),
            in_specs=[pl.BlockSpec((tm, h_dim), lambda i: (i, 0)),
                      pl.BlockSpec((tm, 1), lambda i: (i, 0))],
            out_specs=pl.BlockSpec((1, h_dim), lambda i: (0, 0))),
        compiler_params=pltpu.CompilerParams(
            dimension_semantics=("arbitrary",),
            vmem_limit_bytes=_vmem_limit(tm * h_dim * 4, tm * 4, h_dim * 4)),
    )(h, mask)


def _graph_pool(pool, h, tk):
    g, n_pad = pool.shape
    h_dim = h.shape[1]
    return pl.pallas_call(
        _graph_pool_kernel,
        out_shape=jax.ShapeDtypeStruct((g, h_dim), jnp.float32),
        grid_spec=pltpu.PrefetchScalarGridSpec(
            num_scalar_prefetch=0,
            grid=(n_pad // tk,),
            in_specs=[pl.BlockSpec((g, tk), lambda k: (0, k)),
                      pl.BlockSpec((tk, h_dim), lambda k: (k, 0))],
            out_specs=pl.BlockSpec((g, h_dim), lambda k: (0, 0))),
        compiler_params=pltpu.CompilerParams(
            dimension_semantics=("arbitrary",),
            vmem_limit_bytes=_vmem_limit(g * tk * 4, tk * h_dim * 4, g * h_dim * 4)),
    )(pool, h)


# ----------------------------------------------------------------------------
# Graph preprocessing / parameters
# ----------------------------------------------------------------------------
def build_gcn_norm_adj(edge_index, num_nodes):
    """Dense D^{-1/2}(A+I)D^{-1/2}, matching PyG gcn_norm (edge_index has no self loops)."""
    src = edge_index[0]
    dst = edge_index[1]
    a = jnp.zeros((num_nodes, num_nodes), jnp.float32)
    a = a.at[dst, src].add(1.0)                      # A[target, source]
    a = a + jnp.eye(num_nodes, dtype=jnp.float32)    # add self loops
    deg = jnp.sum(a, axis=1)
    d_inv_sqrt = jnp.where(deg > 0, 1.0 / jnp.sqrt(deg), 0.0)
    return d_inv_sqrt[:, None] * a * d_inv_sqrt[None, :]


def init_params(key):
    """Deterministic synthetic weights (glorot) with non-trivial bias/LN affine."""
    k_w, k_b, k_g, k_be = jax.random.split(key, 4)
    wkeys = jax.random.split(k_w, NUM_GCN_LAYERS)

    def glorot(k, fan_in, fan_out):
        limit = (6.0 / (fan_in + fan_out)) ** 0.5
        return jax.random.uniform(k, (fan_in, fan_out), jnp.float32, -limit, limit)

    w_in = glorot(wkeys[0], FEATURE_DIM, HIDDEN_DIM)                     # (F, H)
    w_rest = jnp.stack([glorot(wkeys[i], HIDDEN_DIM, HIDDEN_DIM)
                        for i in range(1, NUM_GCN_LAYERS)])              # (L-1, H, H)
    biases = 0.02 * jax.random.normal(k_b, (NUM_GCN_LAYERS, 1, HIDDEN_DIM), jnp.float32)
    gammas = 1.0 + 0.05 * jax.random.normal(k_g, (NUM_GCN_LAYERS, 1, HIDDEN_DIM), jnp.float32)
    betas = 0.02 * jax.random.normal(k_be, (NUM_GCN_LAYERS, 1, HIDDEN_DIM), jnp.float32)
    return w_in, w_rest, biases, gammas, betas


# ----------------------------------------------------------------------------
# Forward pass (Pallas) and pure-JAX reference
# ----------------------------------------------------------------------------
def senescence_forward(x, edge_index, params, *, sasp_level=0.0, is_inverted=False,
                       batch=None, num_graphs=None):
    w_in, w_rest, b, gamma, beta = params
    n, f = x.shape
    h_dim = w_in.shape[1]

    tm, tk, n_pad = _choose_tiles(n)

    # Dense normalized adjacency, zero-padded and cast to bf16 (halves the O(N^2) buffer).
    a_norm = build_gcn_norm_adj(edge_index, n)
    a_pad = jnp.zeros((n_pad, n_pad), jnp.bfloat16).at[:n, :n].set(a_norm.astype(jnp.bfloat16))
    h = jnp.zeros((n_pad, f), jnp.float32).at[:n, :].set(x.astype(jnp.float32))

    for layer in range(NUM_GCN_LAYERS):
        w = w_in if layer == 0 else w_rest[layer - 1]
        hw = _hw_matmul(h, w.astype(jnp.bfloat16), tm)                         # (n_pad, H) bf16
        h = _gcn_aggregate(a_pad, hw, b[layer], gamma[layer], beta[layer], tm, tk)  # (n_pad, H) f32

    sign = -1.0 if is_inverted else 1.0
    sasp_scale = sign * (1.0 - float(sasp_level))

    if batch is None:
        # mean over real nodes; fold sign * (1-sasp) * (1/N) into the mask.
        mask = jnp.zeros((n_pad, 1), jnp.float32).at[:n, :].set(sasp_scale / n)
        return _mean_pool(h, mask, tm)                                    # (1, H)
    else:
        g = int(num_graphs) if num_graphs is not None else int(jnp.max(batch)) + 1
        one_hot = (batch[None, :] == jnp.arange(g)[:, None]).astype(jnp.float32)  # (g, n)
        counts = jnp.maximum(one_hot.sum(axis=1, keepdims=True), 1.0)
        pool = jnp.zeros((g, n_pad), jnp.float32).at[:, :n].set(one_hot / counts * sasp_scale)
        return _graph_pool(pool, h, tk)                                   # (g, H)


def reference_forward(x, edge_index, params, *, sasp_level=0.0, is_inverted=False,
                      batch=None, num_graphs=None):
    """Pure-JAX f32 reference mirroring the PyTorch module."""
    w_in, w_rest, b, gamma, beta = params
    n = x.shape[0]
    a = build_gcn_norm_adj(edge_index, n)
    h = x.astype(jnp.float32)
    for layer in range(NUM_GCN_LAYERS):
        w = w_in if layer == 0 else w_rest[layer - 1]
        h = a @ (h @ w) + b[layer]
        mu = jnp.mean(h, axis=-1, keepdims=True)
        var = jnp.mean((h - mu) ** 2, axis=-1, keepdims=True)
        h = (h - mu) / jnp.sqrt(var + LN_EPS) * gamma[layer] + beta[layer]
        h = jnp.maximum(h, 0.0)
    if is_inverted:
        h = -h
    if batch is None:
        pooled = jnp.mean(h, axis=0, keepdims=True)
    else:
        g = int(num_graphs)
        one_hot = (batch[None, :] == jnp.arange(g)[:, None]).astype(jnp.float32)
        counts = jnp.maximum(one_hot.sum(axis=1, keepdims=True), 1.0)
        pooled = (one_hot / counts) @ h
    return pooled * (1.0 - float(sasp_level))


# TODO(synk): stochastic lifecycle methods (transpose / decay / mutate_seq) are host-side
# Python RNG state machinery, not part of the tensor forward pass, and are not kernelized.

if __name__ == "__main__":
    key = jax.random.PRNGKey(0)
    k_x, k_e, k_p = jax.random.split(key, 3)

    N, E = 24, 60
    x = jax.random.normal(k_x, (N, FEATURE_DIM), jnp.float32)

    # random directed edges with no self-loops (PyG add_self_loops then matches A + I)
    src = jax.random.randint(k_e, (E,), 0, N)
    off = jax.random.randint(jax.random.fold_in(k_e, 1), (E,), 0, N - 1)
    dst = (src + 1 + off) % N
    edge_index = jnp.stack([src, dst]).astype(jnp.int32)

    params = init_params(k_p)

    # --- single-graph path (batch=None): masked-sum pooling kernel ---
    out = senescence_forward(x, edge_index, params, sasp_level=0.3, is_inverted=False)
    out = jax.block_until_ready(out)
    assert out.shape == (1, HIDDEN_DIM) and out.dtype == jnp.float32
    assert bool(jnp.all(jnp.isfinite(out)))

    ref = reference_forward(x, edge_index, params, sasp_level=0.3, is_inverted=False)
    ref_mag = float(jnp.max(jnp.abs(ref)))
    err = float(jnp.max(jnp.abs(out - ref)))
    assert err <= 0.05 * max(1.0, ref_mag), f"single-graph mismatch: err={err}, ref_mag={ref_mag}"

    # --- multi-graph path (scatter_mean): pool-matmul kernel ---
    batch_vec = (jnp.arange(N) % 2).astype(jnp.int32)
    out_b = senescence_forward(x, edge_index, params, sasp_level=0.1, is_inverted=True,
                               batch=batch_vec, num_graphs=2)
    out_b = jax.block_until_ready(out_b)
    assert out_b.shape == (2, HIDDEN_DIM) and out_b.dtype == jnp.float32
    assert bool(jnp.all(jnp.isfinite(out_b)))

    ref_b = reference_forward(x, edge_index, params, sasp_level=0.1, is_inverted=True,
                              batch=batch_vec, num_graphs=2)
    ref_b_mag = float(jnp.max(jnp.abs(ref_b)))
    err_b = float(jnp.max(jnp.abs(out_b - ref_b)))
    assert err_b <= 0.05 * max(1.0, ref_b_mag), f"multi-graph mismatch: err={err_b}, ref_mag={ref_b_mag}"

    print("KERNEL_OK")
</pallas_src>

<mosaic_0001>
module attributes {stable_mosaic.version = 11 : i64} {
  func.func @_hw_kernel(%arg0: i32, %arg1: memref<128x256xf32, #tpu.memory_space<vmem>>, %arg2: memref<256x128xbf16, #tpu.memory_space<vmem>>, %arg3: memref<128x128xbf16, #tpu.memory_space<vmem>>) attributes {dimension_semantics = [#tpu.dimension_semantics<parallel>], iteration_bounds = array<i64: 1>, scalar_prefetch = 0 : i64, scratch_operands = 0 : i64, tpu.core_type = #tpu.core_type<tc>, window_params = [{transform_indices = @transform_0, window_bounds = array<i64: 128, 256>}, {pipeline_mode = #tpu.pipeline_mode<synchronous>, transform_indices = @transform_1, window_bounds = array<i64: 256, 128>}, {transform_indices = @transform_2, window_bounds = array<i64: 128, 128>}]} {
    %c0 = arith.constant 0 : index
    %c0_0 = arith.constant 0 : index
    %0 = vector.load %arg1[%c0, %c0_0] : memref<128x256xf32, #tpu.memory_space<vmem>>, vector<128x256xf32>
    %1 = arith.truncf %0 : vector<128x256xf32> to vector<128x256xbf16>
    %c0_1 = arith.constant 0 : index
    %c0_2 = arith.constant 0 : index
    %2 = vector.load %arg2[%c0_1, %c0_2] : memref<256x128xbf16, #tpu.memory_space<vmem>>, vector<256x128xbf16>
    %cst = arith.constant dense<0.000000e+00> : vector<128x128xf32>
    %3 = tpu.matmul %1, %2, %cst {dimension_numbers = #tpu.dot_dimension_numbers<[1], [0], [0], [1], [0, 0, 1, 1], [], []>} : vector<128x256xbf16>, vector<256x128xbf16>, vector<128x128xf32> -> vector<128x128xf32>
    %4 = arith.truncf %3 : vector<128x128xf32> to vector<128x128xbf16>
    %c0_3 = arith.constant 0 : index
    %c0_4 = arith.constant 0 : index
    %5 = vector.load %arg3[%c0_3, %c0_4] : memref<128x128xbf16, #tpu.memory_space<vmem>>, vector<128x128xbf16>
    tpu.vector_store %arg3[%c0_3, %c0_4], %4 {strides = array<i32>} : memref<128x128xbf16, #tpu.memory_space<vmem>>, vector<128x128xbf16>,
    return
  }
  func.func @transform_0(%arg0: i32) -> (i32, i32) {
    %c0_i32 = arith.constant 0 : i32
    %c0_i32_0 = arith.constant 0 : i32
    return %arg0, %c0_i32 : i32, i32
  }
  func.func @transform_1(%arg0: i32) -> (i32, i32) {
    %c0_i32 = arith.constant 0 : i32
    %c0_i32_0 = arith.constant 0 : i32
    %c0_i32_1 = arith.constant 0 : i32
    return %c0_i32, %c0_i32_0 : i32, i32
  }
  func.func @transform_2(%arg0: i32) -> (i32, i32) {
    %c0_i32 = arith.constant 0 : i32
    %c0_i32_0 = arith.constant 0 : i32
    return %arg0, %c0_i32 : i32, i32
  }
}

</mosaic_0001>

<bundles_post_ra>
// kernel: tpu_custom_call.1
= control target key start
LH: loop header
LB: loop body
LE: loop exit
PB: predicated region body
PF: predicated region fallthrough
CT: control target
= control target key end

     0   :  { %7 = vsyncpa [#allocation3], 0  ;;  %s635_s0 = inlined_call_operand.hbm [shape: f32[128,256], index: 0, kind: input, shape index: {}]   ;;  %s636_s1 = inlined_call_operand.hbm [shape: bf16[256,128], index: 1, kind: input, shape index: {}]   ;;  %s637_s2 = inlined_call_operand.hbm [shape: bf16[128,128], index: 2, kind: output, shape index: {}]  }
   0x1   :  { %8 = vsyncpa [#allocation6], 0 }
   0x2   :  { %9 = vsyncpa [#allocation4], 0  ;;  %s14_s11 = sshll.u32 %s635_s0, 4  ;;  %s598_s12 = smov [#allocation2]   ;;  %s15_s11 = int_to_ptr.hbm [resolvable:$true] %s14_s11 }
   0x3   :  { %s16_s13 = sshll.u32 %s598_s12, 4  ;;  %s27_s16 = sshll.u32 %s636_s1, 4  ;;  %s17_s13 = int_to_ptr.vmem [resolvable:$true] %s16_s13  ;;  %s28_s16 = int_to_ptr.hbm [resolvable:$true] %s27_s16 }
   0x4   :  { %s599_s17 = smov 256   ;;  %s600_s18 = smov 16  }
   0x5   :  { %22 = dma.hbm_to_vmem [thread:$0]  %s15_s11, 4096, %s17_s13, [#allocation3], %s599_s17, %s599_s17, %s600_s18  }
   0x6   :  { %s601_s19 = smov [#allocation5]   ;;  %s602_s21 = smov 64  }
   0x7   :  { %s29_s20 = sshll.u32 %s601_s19, 4  ;;  %s603_s22 = smov 4   ;;  %s30_s20 = int_to_ptr.vmem [resolvable:$true] %s29_s20 }
   0x8   :  { %35 = dma.hbm_to_vmem [thread:$0]  %s28_s16, 2048, %s30_s20, [#allocation6], %s602_s21, %s602_s21, %s603_s22  }
   0x9   :  { %592 = dma.done.wait [#allocation3], 4096  }
   0xa   :  { %593 = vsyncadd [#allocation3], 4294963200 }
   0xb   :  { %594 = dma.done.wait [#allocation6], 2048  }
   0xc   :  { %595 = vsyncadd [#allocation6], 4294965248  ;;  %v441_v0 = vld [vmem:[#allocation5 + $0x38] sm:$0xff]  ;;  %v440_v2 = vld [vmem:[#allocation5 + $0x30] sm:$0xff]  ;;  %s604_s0 = smov [#allocation7]   ;;  %s356_s25 = sshll.u32 %s637_s2, 4  ;;  %s357_s25 = int_to_ptr.hbm [resolvable:$true] %s356_s25 }
   0xd   :  { %v449_v1 = vld [vmem:[#allocation5 + $0x78] sm:$0xff]  ;;  %220 = vmatpush.bf16.msra.mxu0 %v441_v0  ;;  %497 = vmatpush.bf16.msra.mxu2 %v441_v0  ;;  %v448_v3 = vld [vmem:[#allocation5 + $0x70] sm:$0xff]  ;;  %v439_v4 = vld [vmem:[#allocation5 + $0x28] sm:$0xff]  ;;  %s354_s1 = sshll.u32 %s604_s0, 4  ;;  %s355_s1 = int_to_ptr.vmem [resolvable:$true] %s354_s1 }
   0xe   :  { %269 = vmatpush.bf16.msra.mxu1 %v449_v1  ;;  %505 = vmatpush.bf16.msra.mxu3 %v449_v1  ;;  %v447_v5 = vld [vmem:[#allocation5 + $0x68] sm:$0xff]  ;;  %v438_v6 = vld [vmem:[#allocation5 + $0x20] sm:$0xff]  ;;  %v437_v8 = vld [vmem:[#allocation5 + $0x18] sm:$0xff] }
   0xf   :  { %v446_v7 = vld [vmem:[#allocation5 + $0x60] sm:$0xff]  ;;  %v445_v9 = vld [vmem:[#allocation5 + $0x58] sm:$0xff]  ;;  %v436_v10 = vld [vmem:[#allocation5 + $0x10] sm:$0xff] }
  0x10   :  { %v444_v11 = vld [vmem:[#allocation5 + $0x50] sm:$0xff]  ;;  %v435_v12 = vld [vmem:[#allocation5 + $0x8] sm:$0xff]  ;;  %v434_v14 = vld [vmem:[#allocation5] sm:$0xff] }
  0x11   :  { %221 = vmatpush.bf16.msra.mxu0 %v440_v2  ;;  %498 = vmatpush.bf16.msra.mxu2 %v440_v2  ;;  %v443_v13 = vld [vmem:[#allocation5 + $0x48] sm:$0xff]  ;;  %v442_v15 = vld [vmem:[#allocation5 + $0x40] sm:$0xff]  ;;  %v46_v17 = vld [vmem:[#allocation2 + $0x10] sm:$0xff] }
  0x12   :  { %270 = vmatpush.bf16.msra.mxu1 %v448_v3  ;;  %506 = vmatpush.bf16.msra.mxu3 %v448_v3  ;;  %v44_v16 = vld [vmem:[#allocation2] sm:$0xff]  ;;  %v62_v19 = vld [vmem:[#allocation2 + $0x90] sm:$0xff]  ;;  %v45_v20 = vld [vmem:[#allocation2 + $0x8] sm:$0xff] }
  0x13   :  { %v60_v18 = vld [vmem:[#allocation2 + $0x80] sm:$0xff]  ;;  %v47_v21 = vld [vmem:[#allocation2 + $0x18] sm:$0xff]  ;;  %v61_v22 = vld [vmem:[#allocation2 + $0x88] sm:$0xff]  ;;  %v76_v24 = vpack.c.bf16 %v46_v17, %v44_v16 }
  0x14   :  { %v63_v23 = vld [vmem:[#allocation2 + $0x98] sm:$0xff]  ;;  %v84_v25 = vpack.c.bf16 %v62_v19, %v60_v18  ;;  %v77_v26 = vpack.c.bf16 %v47_v21, %v45_v20  ;;  %v48_v28 = vld [vmem:[#allocation2 + $0x20] sm:$0xff]  ;;  %v50_v29 = vld [vmem:[#allocation2 + $0x30] sm:$0xff] }
  0x15   :  { %222 = vmatpush.bf16.msra.mxu0 %v439_v4  ;;  %499 = vmatpush.bf16.msra.mxu2 %v439_v4  ;;  %v85_v27 = vpack.c.bf16 %v63_v23, %v61_v22  ;;  %v64_v30 = vld [vmem:[#allocation2 + $0xa0] sm:$0xff]  ;;  %v66_v31 = vld [vmem:[#allocation2 + $0xb0] sm:$0xff]  ;;  %v49_v32 = vld [vmem:[#allocation2 + $0x28] sm:$0xff]  ;;  %v78_v36 = vpack.c.bf16 %v50_v29, %v48_v28 }
  0x16   :  { %271 = vmatpush.bf16.msra.mxu1 %v447_v5  ;;  %507 = vmatpush.bf16.msra.mxu3 %v447_v5  ;;  %v51_v33 = vld [vmem:[#allocation2 + $0x38] sm:$0xff]  ;;  %v65_v34 = vld [vmem:[#allocation2 + $0xa8] sm:$0xff]  ;;  %v86_v37 = vpack.c.bf16 %v66_v31, %v64_v30  ;;  %v52_v40 = vld [vmem:[#allocation2 + $0x40] sm:$0xff] }
  0x17   :  { %v67_v35 = vld [vmem:[#allocation2 + $0xb8] sm:$0xff]  ;;  %v79_v38 = vpack.c.bf16 %v51_v33, %v49_v32  ;;  %v54_v41 = vld [vmem:[#allocation2 + $0x50] sm:$0xff]  ;;  %v68_v42 = vld [vmem:[#allocation2 + $0xc0] sm:$0xff] }
  0x18   :  { %v87_v39 = vpack.c.bf16 %v67_v35, %v65_v34  ;;  %v70_v43 = vld [vmem:[#allocation2 + $0xd0] sm:$0xff]  ;;  %v53_v44 = vld [vmem:[#allocation2 + $0x48] sm:$0xff]  ;;  %v55_v45 = vld [vmem:[#allocation2 + $0x58] sm:$0xff]  ;;  %v80_v48 = vpack.c.bf16 %v54_v41, %v52_v40 }
  0x19   :  { %223 = vmatpush.bf16.msra.mxu0 %v438_v6  ;;  %500 = vmatpush.bf16.msra.mxu2 %v438_v6  ;;  %v69_v46 = vld [vmem:[#allocation2 + $0xc8] sm:$0xff]  ;;  %v71_v47 = vld [vmem:[#allocation2 + $0xd8] sm:$0xff]  ;;  %v88_v49 = vpack.c.bf16 %v70_v43, %v68_v42  ;;  %v81_v50 = vpack.c.bf16 %v55_v45, %v53_v44  ;;  %v56_v52 = vld [vmem:[#allocation2 + $0x60] sm:$0xff] }
  0x1a   :  { %272 = vmatpush.bf16.msra.mxu1 %v446_v7  ;;  %508 = vmatpush.bf16.msra.mxu3 %v446_v7  ;;  %v89_v51 = vpack.c.bf16 %v71_v47, %v69_v46  ;;  %v58_v53 = vld [vmem:[#allocation2 + $0x70] sm:$0xff]  ;;  %v72_v54 = vld [vmem:[#allocation2 + $0xe0] sm:$0xff]  ;;  %v57_v56 = vld [vmem:[#allocation2 + $0x68] sm:$0xff] }
  0x1b   :  { %v74_v55 = vld [vmem:[#allocation2 + $0xf0] sm:$0xff]  ;;  %v59_v57 = vld [vmem:[#allocation2 + $0x78] sm:$0xff]  ;;  %v73_v58 = vld [vmem:[#allocation2 + $0xe8] sm:$0xff]  ;;  %v82_v60 = vpack.c.bf16 %v58_v53, %v56_v52 }
  0x1c   :  { %v75_v59 = vld [vmem:[#allocation2 + $0xf8] sm:$0xff]  ;;  %v90_v61 = vpack.c.bf16 %v74_v55, %v72_v54  ;;  %v83_v62 = vpack.c.bf16 %v59_v57, %v57_v56 }
  0x1d   :  { %224 = vmatpush.bf16.msra.mxu0 %v437_v8  ;;  %501 = vmatpush.bf16.msra.mxu2 %v437_v8  ;;  %v91_v63 = vpack.c.bf16 %v75_v59, %v73_v58 }
  0x1e   :  { %273 = vmatpush.bf16.msra.mxu1 %v445_v9  ;;  %509 = vmatpush.bf16.msra.mxu3 %v445_v9 }
  0x21   :  { %225 = vmatpush.bf16.msra.mxu0 %v436_v10  ;;  %502 = vmatpush.bf16.msra.mxu2 %v436_v10 }
  0x22   :  { %274 = vmatpush.bf16.msra.mxu1 %v444_v11  ;;  %510 = vmatpush.bf16.msra.mxu3 %v444_v11 }
  0x25   :  { %226 = vmatpush.bf16.msra.mxu0 %v435_v12  ;;  %503 = vmatpush.bf16.msra.mxu2 %v435_v12 }
  0x26   :  { %275 = vmatpush.bf16.msra.mxu1 %v443_v13  ;;  %511 = vmatpush.bf16.msra.mxu3 %v443_v13 }
  0x29   :  { %227 = vmatpush.bf16.msra.mxu0 %v434_v14  ;;  %504 = vmatpush.bf16.msra.mxu2 %v434_v14 }
  0x2a   :  { %276 = vmatpush.bf16.msra.mxu1 %v442_v15  ;;  %512 = vmatpush.bf16.msra.mxu3 %v442_v15 }
  0x2c   :  { %228 = vmatmul.bf16.vlgmr.msra.gmra.mxu0 %v76_v24  ;;  %248 = vmatmul.bf16.vlgmr.msra.gmra.mxu2 %v84_v25 }
  0x2d   :  { %277 = vmatmul.bf16.vlgmr.msra.gmra.mxu1 %v77_v26  ;;  %297 = vmatmul.bf16.vlgmr.msra.gmra.mxu3 %v85_v27 }
  0x3c   :  { %233 = vmatmul.bf16.gmra.mxu0 %v78_v36  ;;  %253 = vmatmul.bf16.gmra.mxu2 %v86_v37 }
  0x3d   :  { %282 = vmatmul.bf16.gmra.mxu1 %v79_v38  ;;  %302 = vmatmul.bf16.gmra.mxu3 %v87_v39 }
  0x4c   :  { %238 = vmatmul.bf16.gmra.mxu0 %v80_v48  ;;  %258 = vmatmul.bf16.gmra.mxu2 %v88_v49 }
  0x4d   :  { %287 = vmatmul.bf16.gmra.mxu1 %v81_v50  ;;  %307 = vmatmul.bf16.gmra.mxu3 %v89_v51 }
  0x5c   :  { %243 = vmatmul.bf16.gmra.mxu0 %v82_v60  ;;  %263 = vmatmul.bf16.gmra.mxu2 %v90_v61 }
  0x5d   :  { %292 = vmatmul.bf16.gmra.mxu1 %v83_v62  ;;  %312 = vmatmul.bf16.gmra.mxu3 %v91_v63 }
  0xa9   :  { %v229_v0 = vpop.f32.mrf.mxu0 }
  0xaa   :  { %v278_v1 = vpop.f32.mrf.mxu1 }
  0xab   :  { %v279_v6 = vadd.f32 %v278_v1, %v229_v0 }
  0xaf   :  { %v249_v2 = vpop.f32.mrf.mxu2 }
  0xb0   :  { %v298_v3 = vpop.f32.mrf.mxu3 }
  0xb1   :  { %v231_v4 = vpop.f32.mrf.mxu0  ;;  %v299_v11 = vadd.f32 %v298_v3, %v249_v2 }
  0xb2   :  { %v280_v5 = vpop.f32.mrf.mxu1 }
  0xb3   :  { %v281_v7 = vadd.f32 %v280_v5, %v231_v4 }
  0xb5   :  { %v453_v8 = vpack.c.bf16 %v281_v7, %v279_v6 }
  0xb7   :  { %454 = vst [vmem:[#allocation7] sm:$0xff] %v453_v8   ;;  %v251_v9 = vpop.f32.mrf.mxu2 }
  0xb8   :  { %v300_v10 = vpop.f32.mrf.mxu3 }
  0xb9   :  { %v301_v12 = vadd.f32 %v300_v10, %v251_v9  ;;  %v234_v13 = vpop.f32.mrf.mxu0 }
  0xba   :  { %v283_v14 = vpop.f32.mrf.mxu1 }
  0xbb   :  { %v473_v15 = vpack.c.bf16 %v301_v12, %v299_v11  ;;  %v284_v20 = vadd.f32 %v283_v14, %v234_v13 }
  0xbd   :  { %493 = vst [vmem:[#allocation7 + $0x20] sm:$0xff] %v473_v15  }
  0xbf   :  { %v254_v16 = vpop.f32.mrf.mxu2 }
  0xc0   :  { %v303_v17 = vpop.f32.mrf.mxu3 }
  0xc1   :  { %v236_v18 = vpop.f32.mrf.mxu0  ;;  %v304_v25 = vadd.f32 %v303_v17, %v254_v16 }
  0xc2   :  { %v285_v19 = vpop.f32.mrf.mxu1 }
  0xc3   :  { %v286_v21 = vadd.f32 %v285_v19, %v236_v18 }
  0xc5   :  { %v458_v22 = vpack.c.bf16 %v286_v21, %v284_v20 }
  0xc7   :  { %490 = vst [vmem:[#allocation7 + $0x8] sm:$0xff] %v458_v22   ;;  %v256_v23 = vpop.f32.mrf.mxu2 }
  0xc8   :  { %v305_v24 = vpop.f32.mrf.mxu3 }
  0xc9   :  { %v306_v26 = vadd.f32 %v305_v24, %v256_v23  ;;  %v239_v27 = vpop.f32.mrf.mxu0 }
  0xca   :  { %v288_v28 = vpop.f32.mrf.mxu1 }
  0xcb   :  { %v478_v29 = vpack.c.bf16 %v306_v26, %v304_v25  ;;  %v289_v34 = vadd.f32 %v288_v28, %v239_v27 }
  0xcd   :  { %494 = vst [vmem:[#allocation7 + $0x28] sm:$0xff] %v478_v29  }
  0xcf   :  { %v259_v30 = vpop.f32.mrf.mxu2 }
  0xd0   :  { %v308_v31 = vpop.f32.mrf.mxu3 }
  0xd1   :  { %v241_v32 = vpop.f32.mrf.mxu0  ;;  %v309_v39 = vadd.f32 %v308_v31, %v259_v30 }
  0xd2   :  { %v290_v33 = vpop.f32.mrf.mxu1 }
  0xd3   :  { %v291_v35 = vadd.f32 %v290_v33, %v241_v32 }
  0xd5   :  { %v463_v36 = vpack.c.bf16 %v291_v35, %v289_v34 }
  0xd7   :  { %491 = vst [vmem:[#allocation7 + $0x10] sm:$0xff] %v463_v36   ;;  %v261_v37 = vpop.f32.mrf.mxu2 }
  0xd8   :  { %v310_v38 = vpop.f32.mrf.mxu3 }
  0xd9   :  { %v311_v40 = vadd.f32 %v310_v38, %v261_v37  ;;  %v244_v41 = vpop.f32.mrf.mxu0 }
  0xda   :  { %v293_v42 = vpop.f32.mrf.mxu1 }
  0xdb   :  { %v483_v43 = vpack.c.bf16 %v311_v40, %v309_v39  ;;  %v294_v48 = vadd.f32 %v293_v42, %v244_v41 }
  0xdd   :  { %495 = vst [vmem:[#allocation7 + $0x30] sm:$0xff] %v483_v43  }
  0xdf   :  { %v264_v44 = vpop.f32.mrf.mxu2 }
  0xe0   :  { %v313_v45 = vpop.f32.mrf.mxu3 }
  0xe1   :  { %v246_v46 = vpop.f32.mrf.mxu0  ;;  %v314_v53 = vadd.f32 %v313_v45, %v264_v44 }
  0xe2   :  { %v295_v47 = vpop.f32.mrf.mxu1 }
  0xe3   :  { %v296_v49 = vadd.f32 %v295_v47, %v246_v46 }
  0xe5   :  { %v468_v50 = vpack.c.bf16 %v296_v49, %v294_v48 }
  0xe7   :  { %492 = vst [vmem:[#allocation7 + $0x18] sm:$0xff] %v468_v50   ;;  %v266_v51 = vpop.f32.mrf.mxu2 }
  0xe8   :  { %v315_v52 = vpop.f32.mrf.mxu3 }
  0xe9   :  { %v316_v54 = vadd.f32 %v315_v52, %v266_v51 }
  0xeb   :  { %v488_v55 = vpack.c.bf16 %v316_v54, %v314_v53 }
  0xed   :  { %496 = vst [vmem:[#allocation7 + $0x38] sm:$0xff] %v488_v55  }
  0xee   :  { %362 = dma.vmem_to_hbm [thread:$0]  %s355_s1, 1024, %s357_s25, [#allocation4], %s602_s21, %s602_s21, %s603_s22  }
  0xef   :  { %596 = dma.done.wait [#allocation4], 1024  }
  0xf0   :  { %597 = vsyncadd [#allocation4], 4294966272 }
  0xf1   :  { %367 = vsyncpa [#allocation3], 1 }
  0xf2   :  { %368 = vsyncpa [#allocation6], 1 }
  0xf3   :  { %369 = vsyncpa [#allocation4], 1 }

</bundles_post_ra>
